<compile_context>
chip_gen: v5e
topology: v5e:2x2
jax: 0.10.0
libtpu: 0.0.40
codegen_flags: <defaults>
</compile_context>

<pallas_src>
import jax
import jax.numpy as jnp
from jax.experimental import pallas as pl
from jax.experimental.pallas import tpu as pltpu  # noqa: F401  (TPU backend)

STATE_DIM = 4      # CartPole observation dim
ACTION_DIM = 2     # CartPole action dim
HIDDEN = 128       # hidden width (also the lane-dense padded output width)

# Packed parameter buffer layout: rows of an (N_ROWS, HIDDEN) array.
# Every section starts on a multiple of 8 rows (sublane alignment).
_ROW_W1 = 0                       # 8 rows: rows 0..STATE_DIM-1 = W1, row STATE_DIM = b1, rest 0
_ROW_W2 = _ROW_W1 + 8             # HIDDEN rows
_ROW_B2 = _ROW_W2 + HIDDEN        # 8 rows, row 0 valid
_ROW_W3 = _ROW_B2 + 8             # HIDDEN rows, first ACTION_DIM lanes valid (rest 0)
_ROW_B3 = _ROW_W3 + HIDDEN        # 8 rows, row 0 valid (first ACTION_DIM lanes)
N_ROWS = _ROW_B3 + 8              # = 280  (280 * 128 * 4B ~= 140 KiB, trivially fits VMEM)


def _mlp(x8, p_ref):
    """Three-layer MLP, all matmuls on the MXU with f32 accumulation.

    x8: (Bp, 8) activations with lane STATE_DIM == 1.0 (bias lane), lanes > STATE_DIM == 0.
    p_ref: (N_ROWS, HIDDEN) packed parameter Ref (f32 or bf16).
    Returns (Bp, HIDDEN) f32 Q-slab (lanes >= ACTION_DIM are exact zeros).
    """
    # Layer 1: bias folded into the matmul via the homogeneous-coordinate lane.
    w1 = p_ref[_ROW_W1:_ROW_W1 + 8, :]                 # (8, H)
    h1 = jnp.maximum(
        jnp.dot(x8.astype(w1.dtype), w1, preferred_element_type=jnp.float32), 0.0)

    # Layer 2.
    w2 = p_ref[_ROW_W2:_ROW_W2 + HIDDEN, :]            # (H, H)
    b2 = p_ref[_ROW_B2:_ROW_B2 + 1, :]                 # (1, H) -> implicit broadcast
    h2 = jnp.maximum(
        jnp.dot(h1.astype(w2.dtype), w2, preferred_element_type=jnp.float32) + b2, 0.0)

    # Layer 3 (lane-dense padded output; padded lanes of W3/b3 are zero).
    w3 = p_ref[_ROW_W3:_ROW_W3 + HIDDEN, :]            # (H, H)
    b3 = p_ref[_ROW_B3:_ROW_B3 + 1, :]                 # (1, H)
    return jnp.dot(h2.astype(w3.dtype), w3, preferred_element_type=jnp.float32) + b3


def dqn_kernel(x_ref, p_ref, o_ref):
    o_ref[...] = _mlp(x_ref[...], p_ref).astype(o_ref.dtype)


def dqn_pair_kernel(xo_ref, xt_ref, po_ref, pt_ref, qo_ref, qt_ref):
    # Fused online(s) + target(s') evaluation: one launch, one prologue.
    qo_ref[...] = _mlp(xo_ref[...], po_ref).astype(qo_ref.dtype)
    qt_ref[...] = _mlp(xt_ref[...], pt_ref).astype(qt_ref.dtype)


def pack_params(params, dtype=jnp.float32):
    """Pack (w1, b1, w2, b2, w3, b3) into one (N_ROWS, HIDDEN) buffer.

    b1 is stored in row STATE_DIM of the W1 section so layer 1's bias add is
    folded into its matmul.  Use dtype=jnp.bfloat16 on v5e/v6e to halve the
    param DMA (loosen test tolerances accordingly).
    """
    w1, b1, w2, b2, w3, b3 = params
    buf = jnp.zeros((N_ROWS, HIDDEN), jnp.float32)
    buf = buf.at[_ROW_W1:_ROW_W1 + w1.shape[0], :].set(w1)
    buf = buf.at[_ROW_W1 + w1.shape[0], :].set(b1.reshape(-1))      # bias row
    buf = buf.at[_ROW_W2:_ROW_W2 + HIDDEN, :].set(w2)
    buf = buf.at[_ROW_B2, :].set(b2.reshape(-1))
    buf = buf.at[_ROW_W3:_ROW_W3 + HIDDEN, :w3.shape[1]].set(w3)
    buf = buf.at[_ROW_B3, :b3.shape[-1]].set(b3.reshape(-1))
    return buf.astype(dtype)


def _prep_x(x):
    """Pad states to (Bp, 8): Bp multiple of 8 sublanes, lane STATE_DIM = 1.0."""
    B = x.shape[0]
    Bp = 8 * pl.cdiv(B, 8)
    x8 = jnp.zeros((Bp, 8), jnp.float32)
    x8 = x8.at[:B, :STATE_DIM].set(x.astype(jnp.float32))
    x8 = x8.at[:, STATE_DIM].set(1.0)                  # homogeneous (bias) lane
    return x8


def _cost(bp, packed):
    flops = 2 * bp * (8 * HIDDEN + HIDDEN * HIDDEN + HIDDEN * HIDDEN) + 2 * bp * HIDDEN
    bytes_accessed = bp * 8 * 4 + int(packed.size) * packed.dtype.itemsize + bp * HIDDEN * 4
    return flops, bytes_accessed


@jax.jit
def dqn_forward(x, packed_params):
    """Q-values for a batch of states. x: (B, STATE_DIM) -> (B, ACTION_DIM)."""
    B = x.shape[0]
    x8 = _prep_x(x)
    Bp = x8.shape[0]
    flops, bytes_accessed = _cost(Bp, packed_params)

    q_padded = pl.pallas_call(
        dqn_kernel,
        out_shape=jax.ShapeDtypeStruct((Bp, HIDDEN), jnp.float32),
        # Single invocation (empty grid): everything is VMEM-resident.
        in_specs=[
            pl.BlockSpec((Bp, 8), lambda: (0, 0)),
            pl.BlockSpec((N_ROWS, HIDDEN), lambda: (0, 0)),
        ],
        out_specs=pl.BlockSpec((Bp, HIDDEN), lambda: (0, 0)),
        cost_estimate=pl.CostEstimate(
            flops=flops, transcendentals=0, bytes_accessed=bytes_accessed),
    )(x8, packed_params)

    return q_padded[:B, :ACTION_DIM]


@jax.jit
def dqn_forward_pair(x_online, x_target, packed_online, packed_target):
    """Fused online(s) and target(s') forward passes in a single pallas_call."""
    B_on, B_tg = x_online.shape[0], x_target.shape[0]
    xo, xt = _prep_x(x_online), _prep_x(x_target)
    Bo, Bt = xo.shape[0], xt.shape[0]
    fo, bo = _cost(Bo, packed_online)
    ft, bt = _cost(Bt, packed_target)

    q_on, q_tg = pl.pallas_call(
        dqn_pair_kernel,
        out_shape=(jax.ShapeDtypeStruct((Bo, HIDDEN), jnp.float32),
                   jax.ShapeDtypeStruct((Bt, HIDDEN), jnp.float32)),
        in_specs=[
            pl.BlockSpec((Bo, 8), lambda: (0, 0)),
            pl.BlockSpec((Bt, 8), lambda: (0, 0)),
            pl.BlockSpec((N_ROWS, HIDDEN), lambda: (0, 0)),
            pl.BlockSpec((N_ROWS, HIDDEN), lambda: (0, 0)),
        ],
        out_specs=(pl.BlockSpec((Bo, HIDDEN), lambda: (0, 0)),
                   pl.BlockSpec((Bt, HIDDEN), lambda: (0, 0))),
        cost_estimate=pl.CostEstimate(
            flops=fo + ft, transcendentals=0, bytes_accessed=bo + bt),
    )(xo, xt, packed_online, packed_target)

    return q_on[:B_on, :ACTION_DIM], q_tg[:B_tg, :ACTION_DIM]


def init_params(key, state_dim=STATE_DIM, hidden=HIDDEN, action_dim=ACTION_DIM):
    """Deterministic synthetic init (uniform, like PyTorch's default scale)."""
    ks = jax.random.split(key, 6)

    def lin(kw, kb, fan_in, fan_out):
        bound = 1.0 / jnp.sqrt(fan_in)
        w = jax.random.uniform(kw, (fan_in, fan_out), jnp.float32, -bound, bound)
        b = jax.random.uniform(kb, (1, fan_out), jnp.float32, -bound, bound)
        return w, b

    w1, b1 = lin(ks[0], ks[1], state_dim, hidden)
    w2, b2 = lin(ks[2], ks[3], hidden, hidden)
    w3, b3 = lin(ks[4], ks[5], hidden, action_dim)
    return (w1, b1, w2, b2, w3, b3)


def _ref_forward(params, x):
    """Pure-JAX f32 reference of the same math (highest matmul precision)."""
    w1, b1, w2, b2, w3, b3 = params
    hi = jax.lax.Precision.HIGHEST
    h1 = jnp.maximum(jnp.dot(x, w1, precision=hi) + b1, 0.0)
    h2 = jnp.maximum(jnp.dot(h1, w2, precision=hi) + b2, 0.0)
    return jnp.dot(h2, w3, precision=hi) + b3


if __name__ == "__main__":
    key = jax.random.PRNGKey(0)
    k_on, k_tg, k_x, k_xn = jax.random.split(key, 4)

    params_online = init_params(k_on)
    params_target = init_params(k_tg)
    packed_online = pack_params(params_online)          # f32; bf16 available for v5e
    packed_target = pack_params(params_target)

    # Replay-batch sized input to fill the MXU rows (per perf review); the
    # wrapper handles any B by padding to a multiple of 8 sublanes.
    B = 128
    x = jax.random.normal(k_x, (B, STATE_DIM), dtype=jnp.float32)       # states s
    x_next = jax.random.normal(k_xn, (B, STATE_DIM), dtype=jnp.float32)  # states s'

    # Single-network forward (the nn.Module's forward).
    q = dqn_forward(x, packed_online)
    jax.block_until_ready(q)

    # Fused online(s) + target(s') evaluation: one launch for the DQN step.
    q_on, q_tg = dqn_forward_pair(x, x_next, packed_online, packed_target)
    jax.block_until_ready((q_on, q_tg))

    ref_on = _ref_forward(params_online, x)
    ref_tg = _ref_forward(params_target, x_next)

    assert q.shape == (B, ACTION_DIM)
    assert q_on.shape == (B, ACTION_DIM) and q_tg.shape == (B, ACTION_DIM)
    assert jnp.allclose(q, ref_on, atol=1e-3, rtol=1e-3), (
        float(jnp.max(jnp.abs(q - ref_on))))
    assert jnp.allclose(q_on, ref_on, atol=1e-3, rtol=1e-3), (
        float(jnp.max(jnp.abs(q_on - ref_on))))
    assert jnp.allclose(q_tg, ref_tg, atol=1e-3, rtol=1e-3), (
        float(jnp.max(jnp.abs(q_tg - ref_tg))))

    print("KERNEL_OK")
</pallas_src>

<mosaic_0001>
module attributes {stable_mosaic.version = 11 : i64} {
  func.func @dqn_kernel(%arg0: memref<128x8xf32, #tpu.memory_space<vmem>>, %arg1: memref<280x128xf32, #tpu.memory_space<vmem>>, %arg2: memref<128x128xf32, #tpu.memory_space<vmem>>) attributes {dimension_semantics = [], scalar_prefetch = 0 : i64, scratch_operands = 0 : i64, tpu.core_type = #tpu.core_type<tc>} {
    %c0 = arith.constant 0 : index
    %c0_0 = arith.constant 0 : index
    %0 = vector.load %arg0[%c0, %c0_0] : memref<128x8xf32, #tpu.memory_space<vmem>>, vector<128x8xf32>
    %c0_1 = arith.constant 0 : index
    %c0_2 = arith.constant 0 : index
    %1 = vector.load %arg1[%c0_1, %c0_2] : memref<280x128xf32, #tpu.memory_space<vmem>>, vector<8x128xf32>
    %cst = arith.constant dense<0.000000e+00> : vector<128x128xf32>
    %2 = tpu.matmul %0, %1, %cst {dimension_numbers = #tpu.dot_dimension_numbers<[1], [0], [0], [1], [0, 0, 1, 1], [], []>} : vector<128x8xf32>, vector<8x128xf32>, vector<128x128xf32> -> vector<128x128xf32>
    %cst_3 = arith.constant 0.000000e+00 : f32
    %3 = vector.broadcast %cst_3 : f32 to vector<128x128xf32>
    %4 = arith.maximumf %2, %3 : vector<128x128xf32>
    %c8 = arith.constant 8 : index
    %c0_4 = arith.constant 0 : index
    %5 = vector.load %arg1[%c8, %c0_4] : memref<280x128xf32, #tpu.memory_space<vmem>>, vector<128x128xf32>
    %c136 = arith.constant 136 : index
    %c0_5 = arith.constant 0 : index
    %6 = vector.load %arg1[%c136, %c0_5] : memref<280x128xf32, #tpu.memory_space<vmem>>, vector<1x128xf32>
    %cst_6 = arith.constant dense<0.000000e+00> : vector<128x128xf32>
    %7 = tpu.matmul %4, %5, %cst_6 {dimension_numbers = #tpu.dot_dimension_numbers<[1], [0], [0], [1], [0, 0, 1, 1], [], []>} : vector<128x128xf32>, vector<128x128xf32>, vector<128x128xf32> -> vector<128x128xf32>
    %8 = vector.broadcast %6 : vector<1x128xf32> to vector<128x128xf32>
    %9 = arith.addf %7, %8 : vector<128x128xf32>
    %cst_7 = arith.constant 0.000000e+00 : f32
    %10 = vector.broadcast %cst_7 : f32 to vector<128x128xf32>
    %11 = arith.maximumf %9, %10 : vector<128x128xf32>
    %c144 = arith.constant 144 : index
    %c0_8 = arith.constant 0 : index
    %12 = vector.load %arg1[%c144, %c0_8] : memref<280x128xf32, #tpu.memory_space<vmem>>, vector<128x128xf32>
    %c272 = arith.constant 272 : index
    %c0_9 = arith.constant 0 : index
    %13 = vector.load %arg1[%c272, %c0_9] : memref<280x128xf32, #tpu.memory_space<vmem>>, vector<1x128xf32>
    %cst_10 = arith.constant dense<0.000000e+00> : vector<128x128xf32>
    %14 = tpu.matmul %11, %12, %cst_10 {dimension_numbers = #tpu.dot_dimension_numbers<[1], [0], [0], [1], [0, 0, 1, 1], [], []>} : vector<128x128xf32>, vector<128x128xf32>, vector<128x128xf32> -> vector<128x128xf32>
    %15 = vector.broadcast %13 : vector<1x128xf32> to vector<128x128xf32>
    %16 = arith.addf %14, %15 : vector<128x128xf32>
    %c0_11 = arith.constant 0 : index
    %c0_12 = arith.constant 0 : index
    %17 = vector.load %arg2[%c0_11, %c0_12] : memref<128x128xf32, #tpu.memory_space<vmem>>, vector<128x128xf32>
    tpu.vector_store %arg2[%c0_11, %c0_12], %16 {strides = array<i32>} : memref<128x128xf32, #tpu.memory_space<vmem>>, vector<128x128xf32>,
    return
  }
}

</mosaic_0001>

<bundles_post_ra>
// kernel: dqn_forward.1
= control target key start
LH: loop header
LB: loop body
LE: loop exit
PB: predicated region body
PF: predicated region fallthrough
CT: control target
= control target key end

     0   :  { %vm28_vm0 = vcmask 64512   ;;  %s642_s1 = inlined_call_operand.vmem [shape: f32[280,128], index: 1, kind: input, shape index: {}]   ;;  %s643_s0 = inlined_call_operand.vmem [shape: f32[128,8], index: 0, kind: input, shape index: {}]   ;;  %s644_s2 = inlined_call_operand.vmem [shape: f32[128,128], index: 2, kind: output, shape index: {}]  }
   0x1   :  { %v27_v0 = vld [vmem:[%s642_s1] sm:$0xff]  ;;  %v12_v2 = vld [vmem:[%s643_s0 + $0x8] sm:$0xff]  ;;  %v13_v3 = vld [vmem:[%s643_s0 + $0x10] sm:$0xff] }
   0x2   :  { %v11_v1 = vld [vmem:[%s643_s0] sm:$0xff]  ;;  %92 = vmatpush.msra.mxu0 %v27_v0  ;;  %v14_v4 = vld [vmem:[%s643_s0 + $0x18] sm:$0xff]  ;;  %v16_v6 = vld [vmem:[%s643_s0 + $0x28] sm:$0xff] }
   0x3   :  { %360 = vmatmul.msk.f32.vlgmr.msra.gmra.mxu0 %vm28_vm0, %v11_v1  ;;  %v15_v5 = vld [vmem:[%s643_s0 + $0x20] sm:$0xff]  ;;  %v17_v7 = vld [vmem:[%s643_s0 + $0x30] sm:$0xff]  ;;  %v18_v8 = vld [vmem:[%s643_s0 + $0x38] sm:$0xff] }
   0x4   :  { %v19_v9 = vld [vmem:[%s643_s0 + $0x40] sm:$0xff]  ;;  %v172_v11 = vld [vmem:[%s642_s1 + $0x78] sm:$0xff]  ;;  %v171_v12 = vld [vmem:[%s642_s1 + $0x70] sm:$0xff] }
   0x5   :  { %v173_v10 = vld [vmem:[%s642_s1 + $0x80] sm:$0xff]  ;;  %v170_v13 = vld [vmem:[%s642_s1 + $0x68] sm:$0xff]  ;;  %v168_v16 = vld [vmem:[%s642_s1 + $0x58] sm:$0xff] }
   0x6   :  { %176 = vmatpush.msra.mxu1 %v173_v10  ;;  %376 = vmatpush.msra.mxu3 %v173_v10  ;;  %v20_v14 = vld [vmem:[%s643_s0 + $0x48] sm:$0xff]  ;;  %v169_v15 = vld [vmem:[%s642_s1 + $0x60] sm:$0xff]  ;;  %v167_v17 = vld [vmem:[%s642_s1 + $0x50] sm:$0xff] }
   0x7   :  { %v166_v18 = vld [vmem:[%s642_s1 + $0x48] sm:$0xff]  ;;  %v21_v19 = vld [vmem:[%s643_s0 + $0x50] sm:$0xff]  ;;  %v165_v20 = vld [vmem:[%s642_s1 + $0x40] sm:$0xff] }
   0x8   :  { %177 = vmatpush.msra.mxu1 %v172_v11  ;;  %377 = vmatpush.msra.mxu3 %v172_v11  ;;  %v164_v21 = vld [vmem:[%s642_s1 + $0x38] sm:$0xff]  ;;  %v163_v22 = vld [vmem:[%s642_s1 + $0x30] sm:$0xff]  ;;  %v162_v23 = vld [vmem:[%s642_s1 + $0x28] sm:$0xff] }
   0x9   :  { %v22_v24 = vld [vmem:[%s643_s0 + $0x58] sm:$0xff]  ;;  %v161_v25 = vld [vmem:[%s642_s1 + $0x20] sm:$0xff]  ;;  %v159_v27 = vld [vmem:[%s642_s1 + $0x10] sm:$0xff] }
   0xa   :  { %178 = vmatpush.msra.mxu1 %v171_v12  ;;  %378 = vmatpush.msra.mxu3 %v171_v12  ;;  %v160_v26 = vld [vmem:[%s642_s1 + $0x18] sm:$0xff]  ;;  %v23_v28 = vld [vmem:[%s643_s0 + $0x60] sm:$0xff]  ;;  %v158_v29 = vld [vmem:[%s642_s1 + $0x8] sm:$0xff] }
   0xb   :  { %361 = vmatmul.msk.f32.gmra.mxu0 %vm28_vm0, %v12_v2  ;;  %v24_v30 = vld [vmem:[%s643_s0 + $0x68] sm:$0xff]  ;;  %v25_v31 = vld [vmem:[%s643_s0 + $0x70] sm:$0xff]  ;;  %v26_v32 = vld [vmem:[%s643_s0 + $0x78] sm:$0xff] }
   0xc   :  { %179 = vmatpush.msra.mxu1 %v170_v13  ;;  %379 = vmatpush.msra.mxu3 %v170_v13  ;;  %v272_v51 = vld [vmem:[%s642_s1 + $0x108] sm:$0xff]  ;;  %v271_v52 = vld [vmem:[%s642_s1 + $0x100] sm:$0xff]  ;;  %v270_v55 = vld [vmem:[%s642_s1 + $0xf8] sm:$0xff] }
   0xd   :  { %275 = vmatpush.msra.mxu2 %v272_v51  ;;  %v269_v56 = vld [vmem:[%s642_s1 + $0xf0] sm:$0xff]  ;;  %v268_v57 = vld [vmem:[%s642_s1 + $0xe8] sm:$0xff]  ;;  %v267_v58 = vld [vmem:[%s642_s1 + $0xe0] sm:$0xff] }
   0xe   :  { %180 = vmatpush.msra.mxu1 %v169_v15  ;;  %380 = vmatpush.msra.mxu3 %v169_v15  ;;  %v266_v61 = vld [vmem:[%s642_s1 + $0xd8] sm:$0xff]  ;;  %v265_v62 = vld [vmem:[%s642_s1 + $0xd0] sm:$0xff]  ;;  %v264_v63 = vld [vmem:[%s642_s1 + $0xc8] sm:$0xff] }
   0xf   :  { %276 = vmatpush.msra.mxu2 %v271_v52  ;;  %v263_v0 = vld [vmem:[%s642_s1 + $0xc0] sm:$0xff]  ;;  %v257_v10 = vld [vmem:[%s642_s1 + $0x90] sm:$0xff] }
  0x10   :  { %181 = vmatpush.msra.mxu1 %v168_v16  ;;  %381 = vmatpush.msra.mxu3 %v168_v16 }
  0x11   :  { %277 = vmatpush.msra.mxu2 %v270_v55 }
  0x12   :  { %182 = vmatpush.msra.mxu1 %v167_v17  ;;  %382 = vmatpush.msra.mxu3 %v167_v17  ;;  %v408_v17 = vld [vmem:[%s642_s1 + $0x88] ss:$0 sm:$0xff] }
  0x13   :  { %362 = vmatmul.msk.f32.gmra.mxu0 %vm28_vm0, %v13_v3  ;;  %278 = vmatpush.msra.mxu2 %v269_v56  ;;  %v262_v3 = vld [vmem:[%s642_s1 + $0xb8] sm:$0xff] }
  0x14   :  { %183 = vmatpush.msra.mxu1 %v166_v18  ;;  %383 = vmatpush.msra.mxu3 %v166_v18 }
  0x15   :  { %279 = vmatpush.msra.mxu2 %v268_v57 }
  0x16   :  { %184 = vmatpush.msra.mxu1 %v165_v20  ;;  %384 = vmatpush.msra.mxu3 %v165_v20 }
  0x17   :  { %280 = vmatpush.msra.mxu2 %v267_v58 }
  0x18   :  { %185 = vmatpush.msra.mxu1 %v164_v21  ;;  %385 = vmatpush.msra.mxu3 %v164_v21 }
  0x19   :  { %281 = vmatpush.msra.mxu2 %v266_v61 }
  0x1a   :  { %186 = vmatpush.msra.mxu1 %v163_v22  ;;  %386 = vmatpush.msra.mxu3 %v163_v22 }
  0x1b   :  { %363 = vmatmul.msk.f32.gmra.mxu0 %vm28_vm0, %v14_v4  ;;  %282 = vmatpush.msra.mxu2 %v265_v62  ;;  %v261_v4 = vld [vmem:[%s642_s1 + $0xb0] sm:$0xff] }
  0x1c   :  { %187 = vmatpush.msra.mxu1 %v162_v23  ;;  %387 = vmatpush.msra.mxu3 %v162_v23 }
  0x1d   :  { %283 = vmatpush.msra.mxu2 %v264_v63 }
  0x1e   :  { %188 = vmatpush.msra.mxu1 %v161_v25  ;;  %388 = vmatpush.msra.mxu3 %v161_v25 }
  0x1f   :  { %284 = vmatpush.msra.mxu2 %v263_v0 }
  0x20   :  { %189 = vmatpush.msra.mxu1 %v160_v26  ;;  %389 = vmatpush.msra.mxu3 %v160_v26 }
  0x21   :  { %285 = vmatpush.msra.mxu2 %v262_v3 }
  0x22   :  { %190 = vmatpush.msra.mxu1 %v159_v27  ;;  %390 = vmatpush.msra.mxu3 %v159_v27 }
  0x23   :  { %364 = vmatmul.msk.f32.gmra.mxu0 %vm28_vm0, %v15_v5  ;;  %v260_v5 = vld [vmem:[%s642_s1 + $0xa8] sm:$0xff]  ;;  %286 = vmatpush.msra.mxu2 %v261_v4 }
  0x24   :  { %191 = vmatpush.msra.mxu1 %v158_v29  ;;  %391 = vmatpush.msra.mxu3 %v158_v29 }
  0x25   :  { %287 = vmatpush.msra.mxu2 %v260_v5 }
  0x26   :  { %392 = vmatpush.msrb.mxu3 %v272_v51 }
  0x28   :  { %393 = vmatpush.msrb.mxu3 %v271_v52 }
  0x2a   :  { %394 = vmatpush.msrb.mxu3 %v270_v55 }
  0x2b   :  { %365 = vmatmul.msk.f32.gmra.mxu0 %vm28_vm0, %v16_v6  ;;  %v259_v6 = vld [vmem:[%s642_s1 + $0xa0] sm:$0xff] }
  0x2c   :  { %395 = vmatpush.msrb.mxu3 %v269_v56  ;;  %288 = vmatpush.msra.mxu2 %v259_v6 }
  0x2e   :  { %396 = vmatpush.msrb.mxu3 %v268_v57 }
  0x30   :  { %397 = vmatpush.msrb.mxu3 %v267_v58 }
  0x32   :  { %398 = vmatpush.msrb.mxu3 %v266_v61 }
  0x33   :  { %366 = vmatmul.msk.f32.gmra.mxu0 %vm28_vm0, %v17_v7 }
  0x34   :  { %399 = vmatpush.msrb.mxu3 %v265_v62 }
  0x36   :  { %400 = vmatpush.msrb.mxu3 %v264_v63 }
  0x38   :  { %401 = vmatpush.msrb.mxu3 %v263_v0 }
  0x3a   :  { %402 = vmatpush.msrb.mxu3 %v262_v3 }
  0x3b   :  { %367 = vmatmul.msk.f32.gmra.mxu0 %vm28_vm0, %v18_v8 }
  0x3c   :  { %403 = vmatpush.msrb.mxu3 %v261_v4 }
  0x3e   :  { %404 = vmatpush.msrb.mxu3 %v260_v5 }
  0x40   :  { %405 = vmatpush.msrb.mxu3 %v259_v6 }
  0x43   :  { %368 = vmatmul.msk.f32.gmra.mxu0 %vm28_vm0, %v19_v9  ;;  %v258_v9 = vld [vmem:[%s642_s1 + $0x98] sm:$0xff] }
  0x44   :  { %289 = vmatpush.msra.mxu2 %v258_v9  ;;  %406 = vmatpush.msrb.mxu3 %v258_v9 }
  0x46   :  { %290 = vmatpush.msra.mxu2 %v257_v10  ;;  %407 = vmatpush.msrb.mxu3 %v257_v10 }
  0x4b   :  { %369 = vmatmul.msk.f32.gmra.mxu0 %vm28_vm0, %v20_v14 }
  0x53   :  { %370 = vmatmul.msk.f32.gmra.mxu0 %vm28_vm0, %v21_v19 }
  0x5b   :  { %371 = vmatmul.msk.f32.gmra.mxu0 %vm28_vm0, %v22_v24 }
  0x63   :  { %372 = vmatmul.msk.f32.gmra.mxu0 %vm28_vm0, %v23_v28 }
  0x6b   :  { %373 = vmatmul.msk.f32.gmra.mxu0 %vm28_vm0, %v24_v30 }
  0x73   :  { %374 = vmatmul.msk.f32.gmra.mxu0 %vm28_vm0, %v25_v31 }
  0x7b   :  { %375 = vmatmul.msk.f32.gmra.mxu0 %vm28_vm0, %v26_v32 }
  0x80   :  { %v94_v33 = vpop.f32.mrf.mxu0 }
  0x81   :  { %v142_v34 = vmax.f32 %v94_v33, 0.0 }
  0x83   :  { %192 = vmatmul.f32.vlgmr.msra.gmra.mxu1 %v142_v34 }
  0x88   :  { %v97_v35 = vpop.f32.mrf.mxu0 }
  0x89   :  { %v143_v36 = vmax.f32 %v97_v35, 0.0 }
  0x8b   :  { %195 = vmatmul.f32.gmra.mxu1 %v143_v36 }
  0x90   :  { %v100_v37 = vpop.f32.mrf.mxu0 }
  0x91   :  { %v144_v38 = vmax.f32 %v100_v37, 0.0 }
  0x93   :  { %198 = vmatmul.f32.gmra.mxu1 %v144_v38 }
  0x98   :  { %v103_v39 = vpop.f32.mrf.mxu0 }
  0x99   :  { %v145_v40 = vmax.f32 %v103_v39, 0.0 }
  0x9b   :  { %201 = vmatmul.f32.gmra.mxu1 %v145_v40 }
  0xa0   :  { %v106_v41 = vpop.f32.mrf.mxu0 }
  0xa1   :  { %v146_v42 = vmax.f32 %v106_v41, 0.0 }
  0xa3   :  { %204 = vmatmul.f32.gmra.mxu1 %v146_v42 }
  0xa8   :  { %v109_v43 = vpop.f32.mrf.mxu0 }
  0xa9   :  { %v147_v44 = vmax.f32 %v109_v43, 0.0 }
  0xab   :  { %207 = vmatmul.f32.gmra.mxu1 %v147_v44 }
  0xb0   :  { %v112_v45 = vpop.f32.mrf.mxu0 }
  0xb1   :  { %v148_v46 = vmax.f32 %v112_v45, 0.0 }
  0xb3   :  { %210 = vmatmul.f32.gmra.mxu1 %v148_v46 }
  0xb8   :  { %v115_v47 = vpop.f32.mrf.mxu0 }
  0xb9   :  { %v149_v48 = vmax.f32 %v115_v47, 0.0 }
  0xbb   :  { %213 = vmatmul.f32.gmra.mxu1 %v149_v48 }
  0xc0   :  { %v118_v49 = vpop.f32.mrf.mxu0 }
  0xc1   :  { %v150_v50 = vmax.f32 %v118_v49, 0.0 }
  0xc3   :  { %216 = vmatmul.f32.gmra.mxu1 %v150_v50 }
  0xc8   :  { %v121_v53 = vpop.f32.mrf.mxu0 }
  0xc9   :  { %v151_v54 = vmax.f32 %v121_v53, 0.0 }
  0xcb   :  { %219 = vmatmul.f32.gmra.mxu1 %v151_v54 }
  0xd0   :  { %v124_v59 = vpop.f32.mrf.mxu0 }
  0xd1   :  { %v152_v60 = vmax.f32 %v124_v59, 0.0 }
  0xd3   :  { %222 = vmatmul.f32.gmra.mxu1 %v152_v60 }
  0xd8   :  { %v127_v1 = vpop.f32.mrf.mxu0 }
  0xd9   :  { %v153_v2 = vmax.f32 %v127_v1, 0.0 }
  0xdb   :  { %225 = vmatmul.f32.vlgmr.msra.gmra.mxu3 %v153_v2  ;;  %v409_v2 = vld [vmem:[%s642_s1 + $0x110] ss:$0 sm:$0xff] }
  0xe0   :  { %v130_v7 = vpop.f32.mrf.mxu0 }
  0xe1   :  { %v154_v8 = vmax.f32 %v130_v7, 0.0 }
  0xe3   :  { %228 = vmatmul.f32.gmra.mxu3 %v154_v8 }
  0xe8   :  { %v133_v11 = vpop.f32.mrf.mxu0 }
  0xe9   :  { %v155_v12 = vmax.f32 %v133_v11, 0.0 }
  0xeb   :  { %231 = vmatmul.f32.gmra.mxu3 %v155_v12 }
  0xf0   :  { %v136_v13 = vpop.f32.mrf.mxu0 }
  0xf1   :  { %v156_v14 = vmax.f32 %v136_v13, 0.0 }
  0xf3   :  { %234 = vmatmul.f32.gmra.mxu3 %v156_v14 }
  0xf8   :  { %v139_v15 = vpop.f32.mrf.mxu0 }
  0xf9   :  { %v157_v16 = vmax.f32 %v139_v15, 0.0 }
  0xfb   :  { %237 = vmatmul.f32.gmra.mxu3 %v157_v16 }
 0x100   :  { %v193_v18 = vpop.f32.mrf.mxu1 }
 0x101   :  { %v194_v19 = vadd.f32 %v408_v17, %v193_v18 }
 0x103   :  { %v241_v20 = vmax.f32 %v194_v19, 0.0 }
 0x105   :  { %291 = vmatmul.f32.vlgmr.msra.gmra.mxu2 %v241_v20 }
 0x108   :  { %v196_v21 = vpop.f32.mrf.mxu1 }
 0x109   :  { %v197_v22 = vadd.f32 %v408_v17, %v196_v21 }
 0x10b   :  { %v242_v23 = vmax.f32 %v197_v22, 0.0 }
 0x10d   :  { %294 = vmatmul.f32.gmra.mxu2 %v242_v23 }
 0x110   :  { %v199_v24 = vpop.f32.mrf.mxu1 }
 0x111   :  { %v200_v25 = vadd.f32 %v408_v17, %v199_v24 }
 0x113   :  { %v243_v26 = vmax.f32 %v200_v25, 0.0 }
 0x115   :  { %297 = vmatmul.f32.gmra.mxu2 %v243_v26 }
 0x118   :  { %v202_v27 = vpop.f32.mrf.mxu1 }
 0x119   :  { %v203_v28 = vadd.f32 %v408_v17, %v202_v27 }
 0x11b   :  { %v244_v29 = vmax.f32 %v203_v28, 0.0 }
 0x11d   :  { %300 = vmatmul.f32.gmra.mxu2 %v244_v29 }
 0x120   :  { %v205_v30 = vpop.f32.mrf.mxu1 }
 0x121   :  { %v206_v31 = vadd.f32 %v408_v17, %v205_v30 }
 0x123   :  { %v245_v32 = vmax.f32 %v206_v31, 0.0 }
 0x125   :  { %303 = vmatmul.f32.gmra.mxu2 %v245_v32 }
 0x128   :  { %v208_v33 = vpop.f32.mrf.mxu1 }
 0x129   :  { %v209_v34 = vadd.f32 %v408_v17, %v208_v33 }
 0x12b   :  { %v246_v35 = vmax.f32 %v209_v34, 0.0 }
 0x12d   :  { %306 = vmatmul.f32.gmra.mxu2 %v246_v35 }
 0x130   :  { %v211_v36 = vpop.f32.mrf.mxu1 }
 0x131   :  { %v212_v37 = vadd.f32 %v408_v17, %v211_v36 }
 0x133   :  { %v247_v38 = vmax.f32 %v212_v37, 0.0 }
 0x135   :  { %309 = vmatmul.f32.gmra.mxu2 %v247_v38 }
 0x138   :  { %v214_v39 = vpop.f32.mrf.mxu1 }
 0x139   :  { %v215_v40 = vadd.f32 %v408_v17, %v214_v39 }
 0x13b   :  { %v248_v41 = vmax.f32 %v215_v40, 0.0 }
 0x13d   :  { %312 = vmatmul.f32.gmra.mxu2 %v248_v41 }
 0x140   :  { %v217_v42 = vpop.f32.mrf.mxu1 }
 0x141   :  { %v218_v43 = vadd.f32 %v408_v17, %v217_v42 }
 0x143   :  { %v249_v44 = vmax.f32 %v218_v43, 0.0 }
 0x145   :  { %315 = vmatmul.f32.gmra.mxu2 %v249_v44 }
 0x148   :  { %v220_v45 = vpop.f32.mrf.mxu1 }
 0x149   :  { %v221_v46 = vadd.f32 %v408_v17, %v220_v45 }
 0x14b   :  { %v250_v47 = vmax.f32 %v221_v46, 0.0 }
 0x14d   :  { %318 = vmatmul.f32.gmra.mxu2 %v250_v47 }
 0x150   :  { %v223_v48 = vpop.f32.mrf.mxu1 }
 0x151   :  { %v224_v49 = vadd.f32 %v408_v17, %v223_v48 }
 0x153   :  { %v251_v50 = vmax.f32 %v224_v49, 0.0 }
 0x155   :  { %321 = vmatmul.f32.gmra.mxu2 %v251_v50 }
 0x15e   :  { %v226_v51 = vpop.f32.mrf.mxu3 }
 0x15f   :  { %v227_v52 = vadd.f32 %v408_v17, %v226_v51 }
 0x161   :  { %v252_v53 = vmax.f32 %v227_v52, 0.0 }
 0x163   :  { %324 = vmatmul.f32.vlgmr.msrb.gmra.mxu3 %v252_v53 }
 0x166   :  { %v229_v54 = vpop.f32.mrf.mxu3 }
 0x167   :  { %v230_v55 = vadd.f32 %v408_v17, %v229_v54 }
 0x169   :  { %v253_v56 = vmax.f32 %v230_v55, 0.0 }
 0x16b   :  { %327 = vmatmul.f32.gmra.mxu3 %v253_v56 }
 0x16e   :  { %v232_v57 = vpop.f32.mrf.mxu3 }
 0x16f   :  { %v233_v58 = vadd.f32 %v408_v17, %v232_v57 }
 0x171   :  { %v254_v59 = vmax.f32 %v233_v58, 0.0 }
 0x173   :  { %330 = vmatmul.f32.gmra.mxu3 %v254_v59 }
 0x176   :  { %v235_v60 = vpop.f32.mrf.mxu3 }
 0x177   :  { %v236_v61 = vadd.f32 %v408_v17, %v235_v60 }
 0x179   :  { %v255_v62 = vmax.f32 %v236_v61, 0.0 }
 0x17b   :  { %333 = vmatmul.f32.gmra.mxu3 %v255_v62 }
 0x17e   :  { %v238_v63 = vpop.f32.mrf.mxu3 }
 0x17f   :  { %v239_v0 = vadd.f32 %v408_v17, %v238_v63 }
 0x181   :  { %v256_v1 = vmax.f32 %v239_v0, 0.0 }
 0x183   :  { %336 = vmatmul.f32.gmra.mxu3 %v256_v1 }
 0x188   :  { %v292_v3 = vpop.f32.mrf.mxu2 }
 0x189   :  { %v293_v4 = vadd.f32 %v409_v2, %v292_v3 }
 0x18b   :  { %340 = vst [vmem:[%s644_s2] sm:$0xff] %v293_v4 }
 0x190   :  { %v295_v5 = vpop.f32.mrf.mxu2 }
 0x191   :  { %v296_v6 = vadd.f32 %v409_v2, %v295_v5 }
 0x193   :  { %341 = vst [vmem:[%s644_s2 + $0x8] sm:$0xff] %v296_v6 }
 0x198   :  { %v298_v7 = vpop.f32.mrf.mxu2 }
 0x199   :  { %v299_v8 = vadd.f32 %v409_v2, %v298_v7 }
 0x19b   :  { %342 = vst [vmem:[%s644_s2 + $0x10] sm:$0xff] %v299_v8 }
 0x1a0   :  { %v301_v9 = vpop.f32.mrf.mxu2 }
 0x1a1   :  { %v302_v10 = vadd.f32 %v409_v2, %v301_v9 }
 0x1a3   :  { %343 = vst [vmem:[%s644_s2 + $0x18] sm:$0xff] %v302_v10 }
 0x1a8   :  { %v304_v11 = vpop.f32.mrf.mxu2 }
 0x1a9   :  { %v305_v12 = vadd.f32 %v409_v2, %v304_v11 }
 0x1ab   :  { %344 = vst [vmem:[%s644_s2 + $0x20] sm:$0xff] %v305_v12 }
 0x1b0   :  { %v307_v13 = vpop.f32.mrf.mxu2 }
 0x1b1   :  { %v308_v14 = vadd.f32 %v409_v2, %v307_v13 }
 0x1b3   :  { %345 = vst [vmem:[%s644_s2 + $0x28] sm:$0xff] %v308_v14 }
 0x1b8   :  { %v310_v15 = vpop.f32.mrf.mxu2 }
 0x1b9   :  { %v311_v16 = vadd.f32 %v409_v2, %v310_v15 }
 0x1bb   :  { %346 = vst [vmem:[%s644_s2 + $0x30] sm:$0xff] %v311_v16 }
 0x1c0   :  { %v313_v17 = vpop.f32.mrf.mxu2 }
 0x1c1   :  { %v314_v18 = vadd.f32 %v409_v2, %v313_v17 }
 0x1c3   :  { %347 = vst [vmem:[%s644_s2 + $0x38] sm:$0xff] %v314_v18 }
 0x1c8   :  { %v316_v19 = vpop.f32.mrf.mxu2 }
 0x1c9   :  { %v317_v20 = vadd.f32 %v409_v2, %v316_v19 }
 0x1cb   :  { %348 = vst [vmem:[%s644_s2 + $0x40] sm:$0xff] %v317_v20 }
 0x1d0   :  { %v319_v21 = vpop.f32.mrf.mxu2 }
 0x1d1   :  { %v320_v22 = vadd.f32 %v409_v2, %v319_v21 }
 0x1d3   :  { %349 = vst [vmem:[%s644_s2 + $0x48] sm:$0xff] %v320_v22 }
 0x1d8   :  { %v322_v23 = vpop.f32.mrf.mxu2 }
 0x1d9   :  { %v323_v24 = vadd.f32 %v409_v2, %v322_v23 }
 0x1db   :  { %350 = vst [vmem:[%s644_s2 + $0x50] sm:$0xff] %v323_v24 }
 0x1e6   :  { %v325_v25 = vpop.f32.mrf.mxu3 }
 0x1e7   :  { %v326_v26 = vadd.f32 %v409_v2, %v325_v25 }
 0x1e9   :  { %351 = vst [vmem:[%s644_s2 + $0x58] sm:$0xff] %v326_v26 }
 0x1ee   :  { %v328_v27 = vpop.f32.mrf.mxu3 }
 0x1ef   :  { %v329_v28 = vadd.f32 %v409_v2, %v328_v27 }
 0x1f1   :  { %352 = vst [vmem:[%s644_s2 + $0x60] sm:$0xff] %v329_v28 }
 0x1f6   :  { %v331_v29 = vpop.f32.mrf.mxu3 }
 0x1f7   :  { %v332_v30 = vadd.f32 %v409_v2, %v331_v29 }
 0x1f9   :  { %353 = vst [vmem:[%s644_s2 + $0x68] sm:$0xff] %v332_v30 }
 0x1fe   :  { %v334_v31 = vpop.f32.mrf.mxu3 }
 0x1ff   :  { %v335_v32 = vadd.f32 %v409_v2, %v334_v31 }
 0x201   :  { %354 = vst [vmem:[%s644_s2 + $0x70] sm:$0xff] %v335_v32 }
 0x206   :  { %v337_v33 = vpop.f32.mrf.mxu3 }
 0x207   :  { %v338_v34 = vadd.f32 %v409_v2, %v337_v33 }
 0x209   :  { %355 = vst [vmem:[%s644_s2 + $0x78] sm:$0xff] %v338_v34 }

</bundles_post_ra>
